<compile_context>
chip_gen: v5e
topology: v5e:2x2
jax: 0.10.0
libtpu: 0.0.40
codegen_flags: <defaults>
</compile_context>

<pallas_src>
import numpy as np
import jax
import jax.numpy as jnp
from jax.experimental import pallas as pl
from jax.experimental.pallas import tpu as pltpu


def _fused_mlp_kernel(latT_ref, w1t_ref, b1t_ref, w2t_ref, b2t_ref,
                      w3c_ref, b3_ref, out_ref):
    """Single fused program.  Transposed layout: rows = feature/hidden dim,
    lanes = flattened sample axis r = (b*n_meas + j)*n_t + t, padded to Rp.

    latT_ref : (l_dim, Rp)  pre-broadcast factor product pat*meas*time
    w1t_ref  : (H, l_dim)   b1t_ref : (H, 1)
    w2t_ref  : (H, H)       b2t_ref : (H, 1)
    w3c_ref  : (H, 1)       b3_ref  : (1,)   [SMEM scalar]
    out_ref  : (1, Rp)
    """
    latT = latT_ref[...]                                   # (l_dim, Rp)
    w1t = w1t_ref[...]                                     # (H, l_dim)
    l_dim = latT_ref.shape[0]

    # layer_1: contraction depth K = l_dim (=2) is tiny -> VPU outer-product
    # FMAs (overlap with the MXU work below); bias folded into the first pass.
    h = w1t[:, 0:1] * latT[0:1, :] + b1t_ref[...]          # (H, Rp)
    for k in range(1, l_dim):                              # static, tiny
        h = h + w1t[:, k:k + 1] * latT[k:k + 1, :]
    h1 = jnp.maximum(h, 0.0)                               # (H, Rp)

    # layer_2: the only real matmul -> one dense MXU pass over the whole slab.
    h2 = jnp.maximum(
        jnp.dot(w2t_ref[...], h1, preferred_element_type=jnp.float32)
        + b2t_ref[...], 0.0)                               # (H, Rp)

    # layer_3: M=1 matmul replaced by VPU multiply + XLU sublane reduce
    # (no MXU weight-push/drain for a 1-row result).
    y = jnp.sum(w3c_ref[...] * h2, axis=0, keepdims=True) + b3_ref[0]   # (1, Rp)

    out_ref[...] = y                                       # one lane-dense store


@jax.jit
def xt_tensor_fact_forward(idx_pat, params):
    (pat_lat_w, meas_lat_w, time_lat_w, beta_u, beta_w, covariates_u,
     w1, b1, w2, b2, w3, b3) = params
    n_t, l_dim = time_lat_w.shape
    n_meas = meas_lat_w.shape[0]
    H = w1.shape[1]
    B = idx_pat.shape[0]
    R = B * n_meas * n_t
    Rp = max(128, pl.cdiv(R, 128) * 128)      # lane-dense padded sample axis

    # torch.mm(cov_w_fixed[idx_t, :], beta_w) is only shape-consistent if n_w == 1.
    assert beta_w.shape[0] == 1, "XT_tensor_fact forward requires n_w == 1"

    # Glue that stays in JAX (one XLA fusion under jit): data-dependent
    # embedding gathers, tiny affine maps, and the (b,j,t) factor broadcast.
    cov_w_fixed = jnp.arange(n_t, dtype=jnp.float32)[:, None]           # (n_t, 1)
    pat_feat = pat_lat_w[idx_pat] + covariates_u[idx_pat] @ beta_u      # (B, l_dim)
    time_feat = time_lat_w + cov_w_fixed @ beta_w                       # (n_t, l_dim)

    # latT[k, (b*n_meas + j)*n_t + t] = pat_feat[b,k] * meas_lat[j,k] * time_feat[t,k]
    latT = jnp.einsum('bk,jk,tk->kbjt', pat_feat, meas_lat_w,
                      time_feat).reshape(l_dim, R)                      # (l_dim, R)
    latT = jnp.pad(latT, ((0, 0), (0, Rp - R)))                         # (l_dim, Rp)

    # Layout plumbing only (rows = feature/hidden, lanes = flat sample axis).
    w1t, w2t = w1.T, w2.T                  # (H, l_dim), (H, H)
    b1t, b2t = b1.T, b2.T                  # (H, 1), (H, 1)
    b3s = b3.reshape(1)                    # (1,) scalar -> SMEM

    def vspec(shape):
        return pl.BlockSpec(shape, lambda i, _n=len(shape): (0,) * _n)

    out_flat = pl.pallas_call(
        _fused_mlp_kernel,
        out_shape=jax.ShapeDtypeStruct((1, Rp), jnp.float32),
        grid=(1,),
        in_specs=[
            vspec((l_dim, Rp)),           # latT
            vspec((H, l_dim)),            # w1t
            vspec((H, 1)),                # b1t
            vspec((H, H)),                # w2t
            vspec((H, 1)),                # b2t
            vspec((H, 1)),                # w3 (column, un-transposed)
            pl.BlockSpec(memory_space=pltpu.MemorySpace.SMEM),   # b3 scalar
        ],
        out_specs=pl.BlockSpec((1, Rp), lambda i: (0, 0)),
        compiler_params=pltpu.CompilerParams(dimension_semantics=("arbitrary",)),
    )(latT, w1t, b1t, w2t, b2t, w3, b3s)

    # Slice off the 12 pad lanes; flat order is already (b, j, t) row-major.
    return out_flat[:, :R].reshape(B, n_meas, n_t)


if __name__ == "__main__":
    # Module hyper-parameters (defaults, except n_w=1 which the forward requires).
    n_pat, n_meas, n_t, l_dim, n_u, n_w, H = 10, 5, 25, 2, 2, 1, 20

    key = jax.random.PRNGKey(0)
    ks = jax.random.split(key, 12)
    pat_lat_w = 0.01 * jax.random.normal(ks[0], (n_pat, l_dim), jnp.float32)
    meas_lat_w = 0.01 * jax.random.normal(ks[1], (n_meas, l_dim), jnp.float32)
    time_lat_w = 0.005 * jax.random.normal(ks[2], (n_t, l_dim), jnp.float32)
    beta_u = jax.random.normal(ks[3], (n_u, l_dim), jnp.float32)
    beta_w = jax.random.normal(ks[4], (n_w, l_dim), jnp.float32)
    covariates_u = jax.random.normal(ks[5], (n_pat, n_u), jnp.float32)

    def linear_init(kw, kb, fan_in, fan_out):
        bound = 1.0 / np.sqrt(fan_in)
        w = jax.random.uniform(kw, (fan_in, fan_out), jnp.float32, -bound, bound)
        b = jax.random.uniform(kb, (1, fan_out), jnp.float32, -bound, bound)
        return w, b

    w1, b1 = linear_init(ks[6], ks[7], l_dim, H)    # layer_1: Linear(l_dim, 20)
    w2, b2 = linear_init(ks[8], ks[9], H, H)        # layer_2: Linear(20, 20)
    w3, b3 = linear_init(ks[10], ks[11], H, 1)      # layer_3: Linear(20, 1)

    idx_pat = jnp.array([0, 3, 7, 2], dtype=jnp.int32)   # batch of patient indices

    params = (pat_lat_w, meas_lat_w, time_lat_w, beta_u, beta_w, covariates_u,
              w1, b1, w2, b2, w3, b3)

    out = jax.block_until_ready(xt_tensor_fact_forward(idx_pat, params))

    # Pure-JAX reference of the PyTorch forward.
    cov_w_fixed = jnp.arange(n_t, dtype=jnp.float32)[:, None]
    pat_feat = pat_lat_w[idx_pat] + covariates_u[idx_pat] @ beta_u
    time_feat = time_lat_w + cov_w_fixed @ beta_w
    tft = jnp.einsum('jk,tk->jtk', meas_lat_w, time_feat)
    lat = jnp.einsum('ik,jtk->ijtk', pat_feat, tft)
    h1 = jax.nn.relu(lat @ w1 + b1)
    h2 = jax.nn.relu(h1 @ w2 + b2)
    ref = (h2 @ w3 + b3)[..., 0]      # (B, n_meas, n_t)

    assert out.shape == (idx_pat.shape[0], n_meas, n_t)
    np.testing.assert_allclose(np.asarray(out), np.asarray(ref), rtol=1e-4, atol=1e-5)
    print("KERNEL_OK")
</pallas_src>

<mosaic_0001>
module attributes {stable_mosaic.version = 11 : i64} {
  func.func @_fused_mlp_kernel(%arg0: i32, %arg1: memref<2x512xf32, #tpu.memory_space<vmem>>, %arg2: memref<20x2xf32, #tpu.memory_space<vmem>>, %arg3: memref<20x1xf32, #tpu.memory_space<vmem>>, %arg4: memref<20x20xf32, #tpu.memory_space<vmem>>, %arg5: memref<20x1xf32, #tpu.memory_space<vmem>>, %arg6: memref<20x1xf32, #tpu.memory_space<vmem>>, %arg7: memref<1xf32, #tpu.memory_space<smem>>, %arg8: memref<1x512xf32, #tpu.memory_space<vmem>>) attributes {dimension_semantics = [#tpu.dimension_semantics<arbitrary>], iteration_bounds = array<i64: 1>, scalar_prefetch = 0 : i64, scratch_operands = 0 : i64, tpu.core_type = #tpu.core_type<tc>, window_params = [{pipeline_mode = #tpu.pipeline_mode<synchronous>, transform_indices = @transform_0, window_bounds = array<i64: 2, 512>}, {pipeline_mode = #tpu.pipeline_mode<synchronous>, transform_indices = @transform_1, window_bounds = array<i64: 20, 2>}, {pipeline_mode = #tpu.pipeline_mode<synchronous>, transform_indices = @transform_2, window_bounds = array<i64: 20, 1>}, {pipeline_mode = #tpu.pipeline_mode<synchronous>, transform_indices = @transform_3, window_bounds = array<i64: 20, 20>}, {pipeline_mode = #tpu.pipeline_mode<synchronous>, transform_indices = @transform_4, window_bounds = array<i64: 20, 1>}, {pipeline_mode = #tpu.pipeline_mode<synchronous>, transform_indices = @transform_5, window_bounds = array<i64: 20, 1>}, {transform_indices = @transform_6, window_bounds = array<i64: 1>}, {pipeline_mode = #tpu.pipeline_mode<synchronous>, transform_indices = @transform_7, window_bounds = array<i64: 1, 512>}]} {
    %c0 = arith.constant 0 : index
    %c0_0 = arith.constant 0 : index
    %0 = vector.load %arg1[%c0, %c0_0] : memref<2x512xf32, #tpu.memory_space<vmem>>, vector<2x512xf32>
    %c0_1 = arith.constant 0 : index
    %c0_2 = arith.constant 0 : index
    %1 = vector.load %arg2[%c0_1, %c0_2] : memref<20x2xf32, #tpu.memory_space<vmem>>, vector<20x2xf32>
    %2 = vector.extract_strided_slice %1 {offsets = [0, 0], sizes = [20, 1], strides = [1, 1]} : vector<20x2xf32> to vector<20x1xf32>
    %3 = vector.extract_strided_slice %0 {offsets = [0, 0], sizes = [1, 512], strides = [1, 1]} : vector<2x512xf32> to vector<1x512xf32>
    %4 = vector.broadcast %2 : vector<20x1xf32> to vector<20x512xf32>
    %5 = vector.broadcast %3 : vector<1x512xf32> to vector<20x512xf32>
    %6 = arith.mulf %4, %5 : vector<20x512xf32>
    %c0_3 = arith.constant 0 : index
    %c0_4 = arith.constant 0 : index
    %7 = vector.load %arg3[%c0_3, %c0_4] : memref<20x1xf32, #tpu.memory_space<vmem>>, vector<20x1xf32>
    %8 = vector.broadcast %7 : vector<20x1xf32> to vector<20x512xf32>
    %9 = arith.addf %6, %8 : vector<20x512xf32>
    %10 = vector.extract_strided_slice %1 {offsets = [0, 1], sizes = [20, 1], strides = [1, 1]} : vector<20x2xf32> to vector<20x1xf32>
    %11 = vector.extract_strided_slice %0 {offsets = [1, 0], sizes = [1, 512], strides = [1, 1]} : vector<2x512xf32> to vector<1x512xf32>
    %12 = vector.broadcast %10 : vector<20x1xf32> to vector<20x512xf32>
    %13 = vector.broadcast %11 : vector<1x512xf32> to vector<20x512xf32>
    %14 = arith.mulf %12, %13 : vector<20x512xf32>
    %15 = arith.addf %9, %14 : vector<20x512xf32>
    %cst = arith.constant 0.000000e+00 : f32
    %16 = vector.broadcast %cst : f32 to vector<20x512xf32>
    %17 = arith.maximumf %15, %16 : vector<20x512xf32>
    %c0_5 = arith.constant 0 : index
    %c0_6 = arith.constant 0 : index
    %18 = vector.load %arg4[%c0_5, %c0_6] : memref<20x20xf32, #tpu.memory_space<vmem>>, vector<20x20xf32>
    %cst_7 = arith.constant dense<0.000000e+00> : vector<20x512xf32>
    %19 = tpu.matmul %18, %17, %cst_7 {dimension_numbers = #tpu.dot_dimension_numbers<[1], [0], [0], [1], [0, 0, 1, 1], [], []>} : vector<20x20xf32>, vector<20x512xf32>, vector<20x512xf32> -> vector<20x512xf32>
    %c0_8 = arith.constant 0 : index
    %c0_9 = arith.constant 0 : index
    %20 = vector.load %arg5[%c0_8, %c0_9] : memref<20x1xf32, #tpu.memory_space<vmem>>, vector<20x1xf32>
    %21 = vector.broadcast %20 : vector<20x1xf32> to vector<20x512xf32>
    %22 = arith.addf %19, %21 : vector<20x512xf32>
    %cst_10 = arith.constant 0.000000e+00 : f32
    %23 = vector.broadcast %cst_10 : f32 to vector<20x512xf32>
    %24 = arith.maximumf %22, %23 : vector<20x512xf32>
    %c0_11 = arith.constant 0 : index
    %c0_12 = arith.constant 0 : index
    %25 = vector.load %arg6[%c0_11, %c0_12] : memref<20x1xf32, #tpu.memory_space<vmem>>, vector<20x1xf32>
    %26 = vector.broadcast %25 : vector<20x1xf32> to vector<20x512xf32>
    %27 = arith.mulf %26, %24 : vector<20x512xf32>
    %cst_13 = arith.constant dense<0.000000e+00> : vector<512xf32>
    %28 = vector.multi_reduction <add>, %27, %cst_13 [0] : vector<20x512xf32> to vector<512xf32>
    %29 = vector.shape_cast %28 : vector<512xf32> to vector<1x512xf32>
    %c0_14 = arith.constant 0 : index
    %30 = memref.load %arg7[%c0_14] : memref<1xf32, #tpu.memory_space<smem>>
    %31 = vector.broadcast %30 : f32 to vector<1x512xf32>
    %32 = arith.addf %29, %31 : vector<1x512xf32>
    %c0_15 = arith.constant 0 : index
    %c0_16 = arith.constant 0 : index
    %33 = vector.load %arg8[%c0_15, %c0_16] : memref<1x512xf32, #tpu.memory_space<vmem>>, vector<1x512xf32>
    tpu.vector_store %arg8[%c0_15, %c0_16], %32 {strides = array<i32>} : memref<1x512xf32, #tpu.memory_space<vmem>>, vector<1x512xf32>,
    return
  }
  func.func @transform_0(%arg0: i32) -> (i32, i32) {
    %c0_i32 = arith.constant 0 : i32
    %c0_i32_0 = arith.constant 0 : i32
    %c0_i32_1 = arith.constant 0 : i32
    return %c0_i32, %c0_i32_0 : i32, i32
  }
  func.func @transform_1(%arg0: i32) -> (i32, i32) {
    %c0_i32 = arith.constant 0 : i32
    %c0_i32_0 = arith.constant 0 : i32
    %c0_i32_1 = arith.constant 0 : i32
    return %c0_i32, %c0_i32_0 : i32, i32
  }
  func.func @transform_2(%arg0: i32) -> (i32, i32) {
    %c0_i32 = arith.constant 0 : i32
    %c0_i32_0 = arith.constant 0 : i32
    %c0_i32_1 = arith.constant 0 : i32
    return %c0_i32, %c0_i32_0 : i32, i32
  }
  func.func @transform_3(%arg0: i32) -> (i32, i32) {
    %c0_i32 = arith.constant 0 : i32
    %c0_i32_0 = arith.constant 0 : i32
    %c0_i32_1 = arith.constant 0 : i32
    return %c0_i32, %c0_i32_0 : i32, i32
  }
  func.func @transform_4(%arg0: i32) -> (i32, i32) {
    %c0_i32 = arith.constant 0 : i32
    %c0_i32_0 = arith.constant 0 : i32
    %c0_i32_1 = arith.constant 0 : i32
    return %c0_i32, %c0_i32_0 : i32, i32
  }
  func.func @transform_5(%arg0: i32) -> (i32, i32) {
    %c0_i32 = arith.constant 0 : i32
    %c0_i32_0 = arith.constant 0 : i32
    %c0_i32_1 = arith.constant 0 : i32
    return %c0_i32, %c0_i32_0 : i32, i32
  }
  func.func @transform_6(%arg0: i32) -> i32 {
    %c0_i32 = arith.constant 0 : i32
    %c0_i32_0 = arith.constant 0 : i32
    return %c0_i32 : i32
  }
  func.func @transform_7(%arg0: i32) -> (i32, i32) {
    %c0_i32 = arith.constant 0 : i32
    %c0_i32_0 = arith.constant 0 : i32
    %c0_i32_1 = arith.constant 0 : i32
    return %c0_i32, %c0_i32_0 : i32, i32
  }
}

</mosaic_0001>

<bundles_post_ra>
// kernel: xt_tensor_fact_forward.1
= control target key start
LH: loop header
LB: loop body
LE: loop exit
PB: predicated region body
PF: predicated region fallthrough
CT: control target
= control target key end

     0   :  { %v443_v0 = vmov 0   ;;  %v444_v6 = vmov 1   ;;  %vm192_vm0 = vcmask 1043456   ;;  %vm182_vm1 = vcmask 162816   ;;  %s559_s2 = inlined_call_operand.vmem [shape: f32[20,1], index: 2, kind: input, shape index: {}]   ;;  %s560_s1 = inlined_call_operand.vmem [shape: f32[20,2], index: 1, kind: input, shape index: {}]   ;;  %s561_s4 = inlined_call_operand.vmem [shape: f32[20,1], index: 4, kind: input, shape index: {}]   ;;  %s562_s5 = inlined_call_operand.vmem [shape: f32[20,1], index: 5, kind: input, shape index: {}]   ;;  %s563_s0 = inlined_call_operand.vmem [shape: f32[2,512], index: 0, kind: input, shape index: {}]   ;;  %s564_s3 = inlined_call_operand.vmem [shape: f32[20,20], index: 3, kind: input, shape index: {}]   ;;  %s565_s6 = inlined_call_operand.<no memory space> [shape: f32[1], index: 6, kind: input, shape index: {}]   ;;  %s566_s7 = inlined_call_operand.vmem [shape: f32[1,512], index: 7, kind: output, shape index: {}]  }
   0x1   :  { %435 = vset.pattern.permute.xlu1 %v443_v0  ;;  %434 = vset.pattern.permute.xlu0 %v443_v0  ;;  %v73_v1 = vld [vmem:[%s559_s2 + $0x10] sm:$0xf]  ;;  %v28_v3 = vld [vmem:[%s560_s1] sm:$0xff]  ;;  %v29_v4 = vld [vmem:[%s560_s1 + $0x8] sm:$0xff]  ;;  %vm400_vm2 = vcmask 1040384   ;;  %vm402_vm3 = vcmask 1042434  }
   0x2   :  { %v30_v2 = vld [vmem:[%s560_s1 + $0x10] sm:$0xf]  ;;  %86 = vperm.xlu1 %435, %v73_v1   ;;  %437 = vset.pattern.permute.xlu2 %v443_v0  ;;  %v72_v5 = vld [vmem:[%s559_s2 + $0x8] sm:$0xff]  ;;  %v71_v7 = vld [vmem:[%s559_s2] sm:$0xff]  ;;  %vm404_vm4 = vcmask 1041408  }
   0x3   :  { %43 = vperm.xlu0 %434, %v30_v2   ;;  %33 = vperm.xlu2 %437, %v28_v3   ;;  %v164_v8 = vld [vmem:[%s561_s4] sm:$0xff]  ;;  %v323_v10 = vld [vmem:[%s562_s5 + $0x10] sm:$0xf]  ;;  %v165_v58 = vld [vmem:[%s561_s4 + $0x8] sm:$0xff] }
   0x4   :  { %v321_v9 = vld [vmem:[%s562_s5] sm:$0xff]  ;;  %v166_v57 = vld [vmem:[%s561_s4 + $0x10] sm:$0xf] }
   0x5   :  { %v27_v12 = vld [vmem:[%s563_s0] sm:$0xff] }
   0x6   :  { %v47_v13 = vperm.slane %v27_v12, 0  ;;  %v48_v14 = vperm.slane %v27_v12, 2  ;;  %v49_v15 = vperm.slane %v27_v12, 4  ;;  %v50_v16 = vperm.slane %v27_v12, 6 }
   0x7   :  { %v113_v23 = vperm.slane %v27_v12, 1  ;;  %v114_v24 = vperm.slane %v27_v12, 3  ;;  %v115_v25 = vperm.slane %v27_v12, 5  ;;  %v116_v26 = vperm.slane %v27_v12, 7 }
   0x8   :  { %v55_v19 = vperm.slane %v47_v13, 0  ;;  %v56_v20 = vperm.slane %v48_v14, 0  ;;  %v57_v21 = vperm.slane %v49_v15, 0  ;;  %v58_v22 = vperm.slane %v50_v16, 0 }
   0x9   :  { %v121_v32 = vperm.slane %v113_v23, 1  ;;  %v122_v33 = vperm.slane %v114_v24, 1  ;;  %v123_v34 = vperm.slane %v115_v25, 1  ;;  %v124_v35 = vperm.slane %v116_v26, 1 }
   0xa   :  { %436 = vset.pattern.permute.xlu1 %v444_v6 }
   0xb   :  { %38 = vperm.xlu0 %434, %v29_v4   ;;  %110 = vperm.xlu1 %436, %v30_v2  }
   0xc   :  { %81 = vperm.xlu2 %437, %v72_v5  }
  0x13   :  { %438 = vset.pattern.permute.xlu0 %v444_v6  ;;  %439 = vset.pattern.permute.xlu1 %v443_v0 }
  0x14   :  { %106 = vperm.xlu0 %438, %v29_v4   ;;  %76 = vperm.xlu1 %439, %v71_v7  }
  0x15   :  { %440 = vset.pattern.permute.xlu2 %v444_v6 }
  0x16   :  { %102 = vperm.xlu2 %440, %v28_v3  }
  0x1c   :  { %442 = vset.pattern.permute.xlu0 %v443_v0  ;;  %169 = vperm.xlu1 %439, %v164_v8  }
  0x1d   :  { %179 = vperm.xlu0 %442, %v166_v57  }
  0x1e   :  { %441 = vset.pattern.permute.xlu2 %v443_v0 }
  0x1f   :  { %174 = vperm.xlu2 %441, %v165_v58  }
  0x24   :  { %326 = vperm.xlu1 %439, %v321_v9  }
  0x2c   :  { %336 = vperm.xlu1 %439, %v323_v10  }
  0x5d   :  { %v34_v11 = vpop.permute.xlu2 %33 }
  0x5e   :  { %v59_v46 = vmul.f32 %v55_v19, %v34_v11  ;;  %v60_v47 = vmul.f32 %v56_v20, %v34_v11  ;;  %v61_v63 = vmul.f32 %v57_v21, %v34_v11  ;;  %v62_v0 = vmul.f32 %v58_v22, %v34_v11 }
  0x66   :  { %v82_v27 = vpop.permute.xlu2 %81 }
  0x70   :  { %v103_v53 = vpop.permute.xlu2 %102 }
  0x71   :  { %v125_v1 = vmul.f32 %v121_v32, %v103_v53  ;;  %v126_v2 = vmul.f32 %v122_v33, %v103_v53  ;;  %v127_v4 = vmul.f32 %v123_v34, %v103_v53  ;;  %v128_v5 = vmul.f32 %v124_v35, %v103_v53 }
  0x74   :  { %v87_v18 = vpop.permute.xlu1 %86 }
  0x75   :  { %v44_v17 = vpop.permute.xlu0 %43 }
  0x76   :  { %v67_v28 = vmul.f32 %v55_v19, %v44_v17  ;;  %v68_v29 = vmul.f32 %v56_v20, %v44_v17  ;;  %v69_v30 = vmul.f32 %v57_v21, %v44_v17  ;;  %v70_v31 = vmul.f32 %v58_v22, %v44_v17 }
  0x78   :  { %v97_v38 = vadd.f32 %v87_v18, %v67_v28  ;;  %v98_v39 = vadd.f32 %v87_v18, %v68_v29  ;;  %v99_v40 = vadd.f32 %v87_v18, %v69_v30  ;;  %v100_v41 = vadd.f32 %v87_v18, %v70_v31 }
  0x7d   :  { %v39_v36 = vpop.permute.xlu0 %38  ;;  %v111_v37 = vpop.permute.xlu1 %110 }
  0x7e   :  { %v133_v42 = vmul.f32 %v121_v32, %v111_v37  ;;  %v134_v43 = vmul.f32 %v122_v33, %v111_v37  ;;  %v135_v44 = vmul.f32 %v123_v34, %v111_v37  ;;  %v136_v45 = vmul.f32 %v124_v35, %v111_v37  ;;  %v162_v37 = vld [vmem:[%s564_s3 + $0x8] sm:$0xff] }
  0x7f   :  { %v63_v48 = vmul.f32 %v55_v19, %v39_v36  ;;  %v64_v54 = vmul.f32 %v56_v20, %v39_v36  ;;  %v65_v55 = vmul.f32 %v57_v21, %v39_v36  ;;  %v66_v56 = vmul.f32 %v58_v22, %v39_v36  ;;  %v322_v19 = vld [vmem:[%s562_s5 + $0x8] sm:$0xff]  ;;  %v161_v36 = vld [vmem:[%s564_s3] sm:$0xff] }
  0x80   :  { %v145_v49 = vadd.f32 %v133_v42, %v97_v38  ;;  %v146_v50 = vadd.f32 %v134_v43, %v98_v39  ;;  %v147_v51 = vadd.f32 %v135_v44, %v99_v40  ;;  %v148_v52 = vadd.f32 %v136_v45, %v100_v41  ;;  %331 = vperm.xlu2 %441, %v322_v19   ;;  %v163_v38 = vld [vmem:[%s564_s3 + $0x10] sm:$0xf]  ;;  %v175_v42 = vpop.permute.xlu2 %174 }
  0x81   :  { %v93_v3 = vadd.f32 %v82_v27, %v63_v48  ;;  %v94_v7 = vadd.f32 %v82_v27, %v64_v54  ;;  %v95_v8 = vadd.f32 %v82_v27, %v65_v55  ;;  %v96_v9 = vadd.f32 %v82_v27, %v66_v56 }
  0x82   :  { %v157_v59 = vmax.f32 %v145_v49, 0.0  ;;  %v158_v60 = vmax.f32 %v146_v50, 0.0  ;;  %v159_v61 = vmax.f32 %v147_v51, 0.0  ;;  %v160_v62 = vmax.f32 %v148_v52, 0.0 }
  0x84   :  { %416 = vmatpush.msk.msra.mxu0 %vm192_vm0, %v157_v59  ;;  %420 = vmatpush.msk.msra.mxu1 %vm192_vm0, %v158_v60 }
  0x85   :  { %424 = vmatpush.msk.msra.mxu2 %vm192_vm0, %v159_v61  ;;  %428 = vmatpush.msk.msra.mxu3 %vm192_vm0, %v160_v62 }
  0x86   :  { %v107_v6 = vpop.permute.xlu0 %106  ;;  %v77_v10 = vpop.permute.xlu1 %76 }
  0x87   :  { %v129_v12 = vmul.f32 %v121_v32, %v107_v6  ;;  %v130_v11 = vmul.f32 %v122_v33, %v107_v6  ;;  %v131_v13 = vmul.f32 %v123_v34, %v107_v6  ;;  %v132_v14 = vmul.f32 %v124_v35, %v107_v6 }
  0x88   :  { %v89_v15 = vadd.f32 %v77_v10, %v59_v46  ;;  %v90_v16 = vadd.f32 %v77_v10, %v60_v47  ;;  %v91_v17 = vadd.f32 %v77_v10, %v61_v63  ;;  %v92_v18 = vadd.f32 %v77_v10, %v62_v0 }
  0x89   :  { %v141_v20 = vadd.f32 %v129_v12, %v93_v3  ;;  %v142_v21 = vadd.f32 %v130_v11, %v94_v7  ;;  %v143_v22 = vadd.f32 %v131_v13, %v95_v8  ;;  %v144_v23 = vadd.f32 %v132_v14, %v96_v9 }
  0x8a   :  { %v137_v24 = vadd.f32 %v125_v1, %v89_v15  ;;  %v138_v25 = vadd.f32 %v126_v2, %v90_v16  ;;  %v139_v26 = vadd.f32 %v127_v4, %v91_v17  ;;  %v140_v27 = vadd.f32 %v128_v5, %v92_v18 }
  0x8b   :  { %v153_v28 = vmax.f32 %v141_v20, 0.0  ;;  %v154_v29 = vmax.f32 %v142_v21, 0.0  ;;  %v155_v30 = vmax.f32 %v143_v22, 0.0  ;;  %v156_v31 = vmax.f32 %v144_v23, 0.0 }
  0x8c   :  { %v149_v32 = vmax.f32 %v137_v24, 0.0  ;;  %v150_v33 = vmax.f32 %v138_v25, 0.0  ;;  %v151_v34 = vmax.f32 %v139_v26, 0.0  ;;  %v152_v35 = vmax.f32 %v140_v27, 0.0 }
  0x8d   :  { %219 = vmatpush.msra.mxu0 %v153_v28  ;;  %245 = vmatpush.msra.mxu1 %v154_v29 }
  0x8e   :  { %271 = vmatpush.msra.mxu2 %v155_v30  ;;  %297 = vmatpush.msra.mxu3 %v156_v31  ;;  %v170_v39 = vpop.permute.xlu1 %169 }
  0x8f   :  { %220 = vmatpush.msra.mxu0 %v149_v32  ;;  %246 = vmatpush.msra.mxu1 %v150_v33  ;;  %v180_v55 = vpop.permute.xlu0 %179 }
  0x90   :  { %272 = vmatpush.msra.mxu2 %v151_v34  ;;  %298 = vmatpush.msra.mxu3 %v152_v35 }
  0x91   :  { %417 = vmatmul.msk.f32.vlgmr.msra.gmra.mxu0 %vm182_vm1, %v161_v36  ;;  %421 = vmatmul.msk.f32.vlgmr.msra.gmra.mxu1 %vm182_vm1, %v161_v36 }
  0x92   :  { %425 = vmatmul.msk.f32.vlgmr.msra.gmra.mxu2 %vm182_vm1, %v161_v36  ;;  %429 = vmatmul.msk.f32.vlgmr.msra.gmra.mxu3 %vm182_vm1, %v161_v36 }
  0x96   :  { %v327_v47 = vpop.permute.xlu1 %326 }
  0x99   :  { %418 = vmatmul.msk.f32.gmra.mxu0 %vm182_vm1, %v162_v37  ;;  %422 = vmatmul.msk.f32.gmra.mxu1 %vm182_vm1, %v162_v37 }
  0x9a   :  { %426 = vmatmul.msk.f32.gmra.mxu2 %vm182_vm1, %v162_v37  ;;  %430 = vmatmul.msk.f32.gmra.mxu3 %vm182_vm1, %v162_v37 }
  0x9e   :  { %v337_v8 = vpop.permute.xlu1 %336 }
  0xa1   :  { %419 = vmatmul.msk.f32.gmra.mxu0 %vm182_vm1, %v163_v38  ;;  %423 = vmatmul.msk.f32.gmra.mxu1 %vm182_vm1, %v163_v38 }
  0xa2   :  { %427 = vmatmul.msk.f32.gmra.mxu2 %vm182_vm1, %v163_v38  ;;  %431 = vmatmul.msk.f32.gmra.mxu3 %vm182_vm1, %v163_v38 }
  0xda   :  { %v332_v54 = vpop.permute.xlu2 %331 }
 0x10e   :  { %v222_v40 = vpop.f32.mrf.mxu0  ;;  %v248_v41 = vpop.f32.mrf.mxu1 }
 0x10f   :  { %v223_v50 = vadd.f32 %v222_v40, %v170_v39  ;;  %v249_v51 = vadd.f32 %v248_v41, %v170_v39 }
 0x111   :  { %v309_v58 = vmax.f32 %v223_v50, 0.0  ;;  %v310_v59 = vmax.f32 %v249_v51, 0.0 }
 0x113   :  { %v339_v9 = vmul.f32 %v327_v47, %v309_v58  ;;  %v340_v10 = vmul.f32 %v327_v47, %v310_v59 }
 0x115   :  { %v274_v43 = vpop.f32.mrf.mxu2  ;;  %v300_v44 = vpop.f32.mrf.mxu3 }
 0x116   :  { %v225_v45 = vpop.f32.mrf.mxu0  ;;  %v251_v46 = vpop.f32.mrf.mxu1  ;;  %v275_v4 = vadd.f32 %v274_v43, %v170_v39  ;;  %v301_v5 = vadd.f32 %v300_v44, %v170_v39 }
 0x117   :  { %v226_v48 = vadd.f32 %v225_v45, %v175_v42  ;;  %v252_v49 = vadd.f32 %v251_v46, %v175_v42 }
 0x118   :  { %v311_v17 = vmax.f32 %v275_v4, 0.0  ;;  %v312_v18 = vmax.f32 %v301_v5, 0.0 }
 0x119   :  { %v313_v52 = vmax.f32 %v226_v48, 0.0  ;;  %v314_v53 = vmax.f32 %v252_v49, 0.0 }
 0x11a   :  { %v341_v33 = vmul.f32 %v327_v47, %v311_v17  ;;  %v342_v34 = vmul.f32 %v327_v47, %v312_v18 }
 0x11b   :  { %v343_v2 = vmul.f32 %v332_v54, %v313_v52  ;;  %v344_v3 = vmul.f32 %v332_v54, %v314_v53 }
 0x11d   :  { %v277_v56 = vpop.f32.mrf.mxu2  ;;  %v303_v57 = vpop.f32.mrf.mxu3  ;;  %v351_v15 = vadd.f32 %v343_v2, %v339_v9  ;;  %v360_v16 = vadd.f32 %v344_v3, %v340_v10  ;;  %v407_v3 = vlaneseq }
 0x11e   :  { %v228_v60 = vpop.f32.mrf.mxu0  ;;  %v254_v61 = vpop.f32.mrf.mxu1  ;;  %v278_v62 = vadd.f32 %v277_v56, %v175_v42  ;;  %v304_v63 = vadd.f32 %v303_v57, %v175_v42  ;;  %v388_v57 = vstv %s565_s6 }
 0x11f   :  { %v229_v0 = vadd.f32 %v228_v60, %v180_v55  ;;  %v255_v1 = vadd.f32 %v254_v61, %v180_v55  ;;  %vm409_vm5 = vcmp.lt.s32.totalorder %v407_v3, 512 }
 0x120   :  { %v315_v12 = vmax.f32 %v278_v62, 0.0  ;;  %v316_v11 = vmax.f32 %v304_v63, 0.0 }
 0x121   :  { %v317_v6 = vmax.f32 %v229_v0, 0.0  ;;  %v318_v7 = vmax.f32 %v255_v1, 0.0 }
 0x122   :  { %v345_v27 = vmul.f32 %v332_v54, %v315_v12  ;;  %v346_v28 = vmul.f32 %v332_v54, %v316_v11 }
 0x123   :  { %v347_v13 = vmul.f32 %v337_v8, %v317_v6  ;;  %v348_v14 = vmul.f32 %v337_v8, %v318_v7 }
 0x124   :  { %v369_v39 = vadd.f32 %v345_v27, %v341_v33  ;;  %v378_v40 = vadd.f32 %v346_v28, %v342_v34 }
 0x125   :  { %v352_v19 = vsel %vm192_vm0, %v347_v13, 0.0  ;;  %v361_v20 = vsel %vm192_vm0, %v348_v14, 0.0  ;;  %v280_v21 = vpop.f32.mrf.mxu2  ;;  %v306_v22 = vpop.f32.mrf.mxu3 }
 0x126   :  { %v353_v23 = vadd.f32 %v352_v19, %v351_v15  ;;  %v362_v24 = vadd.f32 %v361_v20, %v360_v16  ;;  %v281_v25 = vadd.f32 %v280_v21, %v180_v55  ;;  %v307_v26 = vadd.f32 %v306_v22, %v180_v55 }
 0x128   :  { %v354_v29 = vrot.slane %v353_v23, 4  ;;  %v363_v30 = vrot.slane %v362_v24, 4  ;;  %v319_v31 = vmax.f32 %v281_v25, 0.0  ;;  %v320_v32 = vmax.f32 %v307_v26, 0.0 }
 0x12a   :  { %v355_v35 = vadd.f32 %v354_v29, %v353_v23  ;;  %v364_v36 = vadd.f32 %v363_v30, %v362_v24  ;;  %v349_v37 = vmul.f32 %v337_v8, %v319_v31  ;;  %v350_v38 = vmul.f32 %v337_v8, %v320_v32 }
 0x12c   :  { %v365_v41 = vrot.slane %v364_v36, 2  ;;  %v370_v42 = vsel %vm192_vm0, %v349_v37, 0.0  ;;  %v379_v43 = vsel %vm192_vm0, %v350_v38, 0.0  ;;  %v356_v44 = vrot.slane %v355_v35, 2 }
 0x12d   :  { %v371_v45 = vadd.f32 %v370_v42, %v369_v39  ;;  %v380_v46 = vadd.f32 %v379_v43, %v378_v40 }
 0x12e   :  { %v366_v48 = vadd.f32 %v365_v41, %v364_v36  ;;  %v357_v52 = vadd.f32 %v356_v44, %v355_v35 }
 0x12f   :  { %v372_v49 = vrot.slane %v371_v45, 4  ;;  %v381_v50 = vrot.slane %v380_v46, 4 }
 0x130   :  { %v367_v51 = vrot.slane %v366_v48, 1  ;;  %v358_v58 = vrot.slane %v357_v52, 1 }
 0x131   :  { %v373_v47 = vadd.f32 %v372_v49, %v371_v45  ;;  %v382_v53 = vadd.f32 %v381_v50, %v380_v46 }
 0x132   :  { %v368_v54 = vadd.f32 %v367_v51, %v366_v48  ;;  %v359_v0 = vadd.f32 %v358_v58, %v357_v52 }
 0x133   :  { %v374_v55 = vrot.slane %v373_v47, 2  ;;  %v383_v56 = vrot.slane %v382_v53, 2 }
 0x134   :  { %v390_v61 = vadd.f32 %v388_v57, %v368_v54  ;;  %v389_v7 = vadd.f32 %v388_v57, %v359_v0 }
 0x135   :  { %v375_v59 = vadd.f32 %v374_v55, %v373_v47  ;;  %v384_v60 = vadd.f32 %v383_v56, %v382_v53 }
 0x136   :  { %v397_v4 = vrot.slane %v390_v61, 7 }
 0x137   :  { %v376_v62 = vrot.slane %v375_v59, 1  ;;  %v385_v63 = vrot.slane %v384_v60, 1 }
 0x138   :  { %v401_v10 = vsel %vm400_vm2, %v389_v7, %v397_v4 }
 0x139   :  { %v377_v1 = vadd.f32 %v376_v62, %v375_v59  ;;  %v386_v2 = vadd.f32 %v385_v63, %v384_v60 }
 0x13b   :  { %v391_v5 = vadd.f32 %v388_v57, %v377_v1  ;;  %v392_v6 = vadd.f32 %v388_v57, %v386_v2 }
 0x13d   :  { %v398_v8 = vrot.slane %v391_v5, 6  ;;  %v399_v9 = vrot.slane %v392_v6, 5 }
 0x13f   :  { %v403_v12 = vsel %vm402_vm3, %v398_v8, %v399_v9 }
 0x140   :  { %v405_v11 = vsel %vm404_vm4, %v401_v10, %v403_v12 }
 0x141   :  { %411 = vst.msk [vmem:[%s566_s7] sm:$0xf] %vm409_vm5, %v405_v11 }

</bundles_post_ra>
